<compile_context>
chip_gen: v5e
topology: v5e:2x2
jax: 0.10.0
libtpu: 0.0.40
codegen_flags: <defaults>
</compile_context>

<pallas_src>
import jax
import jax.numpy as jnp
from jax.experimental import pallas as pl
from jax.experimental.pallas import tpu as pltpu


# Tile caps: lane-dense, MXU friendly (multiples of 256 for the v6e/v7x
# 256-wide MXU).  Double-buffered working set at the caps is ~7 MiB, well
# inside the default 32 MiB scoped VMEM on every generation (incl. v7x 64 MiB).
_TM_CAP, _TN_CAP, _TK_CAP = 512, 512, 1024


def _round_up(x, m):
    return ((x + m - 1) // m) * m


def _pad2d(a, rows, cols):
    pr, pc = rows - a.shape[0], cols - a.shape[1]
    if pr == 0 and pc == 0:
        return a
    return jnp.pad(a, ((0, pr), (0, pc)))


def _pick_tile(dim_pad, cap):
    """Largest multiple of 128 that divides dim_pad and is <= cap.

    Prefers multiples of 256 (v6e/v7x MXU width).  dim_pad is a multiple of
    128, so 128 is always a valid fallback.
    """
    if dim_pad <= cap:
        return dim_pad
    divs = [t for t in range(128, cap + 1, 128) if dim_pad % t == 0]
    divs256 = [t for t in divs if t % 256 == 0]
    return max(divs256) if divs256 else max(divs)


def _lora_kernel_f32out(x_ref, w_ref, bias_ref, xa_ref, b_ref, o_ref):
    """f32 output: o_ref doubles as the accumulator (no scratch, no epilogue copy).

    x_ref:    (tm, tk)     bf16  activation tile                 idx (i, k)
    w_ref:    (tk, tn)     bf16  base weight tile, (K, N) layout idx (k, j)
    bias_ref: (1,  tn)     f32   bias tile                       idx (0, j)
    xa_ref:   (tm, r_pad)  bf16  LoRA down-projection x @ A.T    idx (i, 0)
    b_ref:    (r_pad, tn)  bf16  scale-folded LoRA up weight     idx (0, j)
    o_ref:    (tm, tn)     f32   output tile (resident across k) idx (i, j)
    """
    k = pl.program_id(2)

    @pl.when(k == 0)
    def _init():
        # Rank-r LoRA up-projection + bias: hidden under the first k-step's
        # DMA ramp instead of serializing before the output store.
        o_ref[...] = jnp.dot(xa_ref[...], b_ref[...],
                             preferred_element_type=jnp.float32) + bias_ref[...]

    o_ref[...] += jnp.dot(x_ref[...], w_ref[...],
                          preferred_element_type=jnp.float32)


def _lora_kernel_scratch(x_ref, w_ref, bias_ref, xa_ref, b_ref, o_ref, acc_ref):
    """Non-f32 outputs: accumulate in an f32 VMEM scratch, cast-only store at k==last."""
    k = pl.program_id(2)

    @pl.when(k == 0)
    def _init():
        acc_ref[...] = jnp.dot(xa_ref[...], b_ref[...],
                               preferred_element_type=jnp.float32) + bias_ref[...]

    acc_ref[...] += jnp.dot(x_ref[...], w_ref[...],
                            preferred_element_type=jnp.float32)

    @pl.when(k == pl.num_programs(2) - 1)
    def _store():
        o_ref[...] = acc_ref[...].astype(o_ref.dtype)


def prepare_lora_params(weight, bias, A, B, r, alpha=None):
    """One-time parameter prep (transpose to MXU-native (K, N), cast, pad, fold scale).

    Runs once at load time so the per-call hot path never transposes, casts or
    pads the large static weights.  Padding is only to the 128-lane granule.
    """
    alpha = alpha if alpha is not None else r
    scale = float(alpha) / float(r)

    out_dim, in_dim = weight.shape
    n_pad = _round_up(out_dim, 128)
    k_pad = _round_up(in_dim, 128)
    r_pad = _round_up(r, 128)  # pad rank to the lane granule

    w_kn = _pad2d(weight.T, k_pad, n_pad).astype(jnp.bfloat16)        # (K_pad, N_pad)
    a_kr = _pad2d(A.T, k_pad, r_pad).astype(jnp.bfloat16)             # (K_pad, r_pad)
    b_rn = _pad2d((B * scale).T, r_pad, n_pad).astype(jnp.bfloat16)   # (r_pad, N_pad)
    if bias is None:
        bias2d = jnp.zeros((1, n_pad), jnp.float32)
    else:
        bias2d = _pad2d(bias.reshape(1, out_dim).astype(jnp.float32), 1, n_pad)

    return dict(w=w_kn, a=a_kr, b=b_rn, bias=bias2d,
                out_dim=out_dim, in_dim=in_dim,
                n_pad=n_pad, k_pad=k_pad, r_pad=r_pad)


def lora_linear(x, params):
    """x: (batch, seq, in_dim) -> (batch, seq, out_dim)."""
    batch, seq, in_dim = x.shape
    assert in_dim == params["in_dim"]
    out_dim = params["out_dim"]
    n_pad, k_pad, r_pad = params["n_pad"], params["k_pad"], params["r_pad"]

    M = batch * seq
    if M <= _TM_CAP:
        # Single block along M; pad only to the bf16 sublane-pack granule (16).
        m_pad = _round_up(M, 16)
        tm = m_pad
    else:
        # Large M: 256-multiple tiles to fill the v6e/v7x 256-wide MXU.
        m_pad = _round_up(M, 256)
        tm = _pick_tile(m_pad, _TM_CAP)

    tn = _pick_tile(n_pad, _TN_CAP)
    tk = _pick_tile(k_pad, _TK_CAP)

    # v7x has 2 TensorCores sharded over the "parallel" grid axes: if both
    # parallel axes collapse to a single block, split N (when possible) so
    # neither core idles.
    if m_pad // tm == 1 and n_pad // tn == 1 and n_pad >= 256:
        tn = _pick_tile(n_pad, n_pad // 2)

    x2d = _pad2d(x.reshape(M, in_dim), m_pad, k_pad).astype(jnp.bfloat16)

    # Tiny per-call pre-pass: LoRA down-projection xa = x @ A.T -> (M, r_pad),
    # computed once instead of once per (j, k) grid step.  Carried at bf16
    # like the activations (f32 accumulation on the MXU).
    xa = jnp.dot(x2d, params["a"],
                 preferred_element_type=jnp.float32).astype(jnp.bfloat16)

    grid = (m_pad // tm, n_pad // tn, k_pad // tk)
    out_dtype = x.dtype

    in_specs = [
        pl.BlockSpec((tm, tk), lambda i, j, k: (i, k)),       # x          (M, K)
        pl.BlockSpec((tk, tn), lambda i, j, k: (k, j)),       # W.T        (K, N)
        pl.BlockSpec((1, tn), lambda i, j, k: (0, j)),        # bias       (1, N)
        pl.BlockSpec((tm, r_pad), lambda i, j, k: (i, 0)),    # x @ A.T    (M, r)
        pl.BlockSpec((r_pad, tn), lambda i, j, k: (0, j)),    # scale*B.T  (r, N)
    ]
    out_spec = pl.BlockSpec((tm, tn), lambda i, j, k: (i, j))

    if out_dtype == jnp.float32:
        kernel, scratch = _lora_kernel_f32out, []
    else:
        kernel, scratch = _lora_kernel_scratch, [pltpu.VMEM((tm, tn), jnp.float32)]

    out = pl.pallas_call(
        kernel,
        out_shape=jax.ShapeDtypeStruct((m_pad, n_pad), out_dtype),
        grid_spec=pltpu.PrefetchScalarGridSpec(
            num_scalar_prefetch=0,
            grid=grid,
            in_specs=in_specs,
            out_specs=out_spec,
            scratch_shapes=scratch,
        ),
        compiler_params=pltpu.CompilerParams(
            dimension_semantics=("parallel", "parallel", "arbitrary")),
    )(x2d, params["w"], params["bias"], xa, params["b"])

    # Skip the slice copy entirely when padding was a no-op.
    if m_pad != M or n_pad != out_dim:
        out = out[:M, :out_dim]
    return out.reshape(batch, seq, out_dim)


if __name__ == "__main__":
    # Small shapes consistent with the module: nn.Linear(32, 32), r=4, alpha=8.
    batch, seq, in_dim, out_dim, r, alpha = 2, 8, 32, 32, 4, 8

    key = jax.random.PRNGKey(0)
    kx, kw, kb, ka, kbb = jax.random.split(key, 5)

    bound = 1.0 / (in_dim ** 0.5)
    weight = jax.random.uniform(kw, (out_dim, in_dim), jnp.float32, -bound, bound)
    bias = jax.random.uniform(kb, (out_dim,), jnp.float32, -bound, bound)
    A = jax.random.normal(ka, (r, in_dim), jnp.float32) * (1.0 / (in_dim ** 0.5))
    # The module initializes B to zeros; use small nonzero values here so the
    # LoRA path is actually exercised numerically.
    B = jax.random.normal(kbb, (out_dim, r), jnp.float32) * 0.05

    x = jax.random.normal(kx, (batch, seq, in_dim), jnp.float32)

    params = prepare_lora_params(weight, bias, A, B, r, alpha)
    y = jax.block_until_ready(lora_linear(x, params))
    assert y.shape == (batch, seq, out_dim)

    scale = alpha / r
    # Reference 1: exact module semantics in f32 (loose tolerance — MXU
    # operands are fed in bf16).
    ref_f32 = x @ weight.T + bias + (x @ A.T @ B.T) * scale
    assert jnp.allclose(y, ref_f32, atol=3e-2, rtol=3e-2), "mismatch vs f32 reference"

    # Reference 2: mirror the kernel's bf16-input / f32-accumulate numerics.
    up = lambda a: a.astype(jnp.bfloat16).astype(jnp.float32)
    xa_ref = (up(x) @ up(A).T).astype(jnp.bfloat16).astype(jnp.float32)
    ref_bf16 = up(x) @ up(weight).T + bias + xa_ref @ up(B * scale).T
    assert jnp.allclose(y, ref_bf16, atol=1e-3, rtol=1e-3), "mismatch vs bf16 reference"

    # Also exercise the non-f32-output (scratch accumulator) kernel variant.
    y_bf16 = jax.block_until_ready(lora_linear(x.astype(jnp.bfloat16), params))
    assert y_bf16.shape == (batch, seq, out_dim)
    assert y_bf16.dtype == jnp.bfloat16
    assert jnp.allclose(y_bf16.astype(jnp.float32), ref_f32, atol=6e-2, rtol=6e-2), \
        "mismatch vs f32 reference (bf16 output path)"

    print("KERNEL_OK")
</pallas_src>

<mosaic_0001>
module attributes {stable_mosaic.version = 11 : i64} {
  func.func @_lora_kernel_f32out(%arg0: i32, %arg1: i32, %arg2: i32, %arg3: memref<16x128xbf16, #tpu.memory_space<vmem>>, %arg4: memref<128x128xbf16, #tpu.memory_space<vmem>>, %arg5: memref<1x128xf32, #tpu.memory_space<vmem>>, %arg6: memref<16x128xbf16, #tpu.memory_space<vmem>>, %arg7: memref<128x128xbf16, #tpu.memory_space<vmem>>, %arg8: memref<16x128xf32, #tpu.memory_space<vmem>>) attributes {dimension_semantics = [#tpu.dimension_semantics<parallel>, #tpu.dimension_semantics<parallel>, #tpu.dimension_semantics<arbitrary>], iteration_bounds = array<i64: 1, 1, 1>, scalar_prefetch = 0 : i64, scratch_operands = 0 : i64, tpu.core_type = #tpu.core_type<tc>, window_params = [{transform_indices = @transform_0, window_bounds = array<i64: 16, 128>}, {transform_indices = @transform_1, window_bounds = array<i64: 128, 128>}, {transform_indices = @transform_2, window_bounds = array<i64: 1, 128>}, {transform_indices = @transform_3, window_bounds = array<i64: 16, 128>}, {transform_indices = @transform_4, window_bounds = array<i64: 128, 128>}, {transform_indices = @transform_5, window_bounds = array<i64: 16, 128>}]} {
    %c0_i32 = arith.constant 0 : i32
    %0 = arith.cmpi eq, %arg2, %c0_i32 : i32
    %1 = arith.extui %0 : i1 to i32
    %c0_i32_0 = arith.constant 0 : i32
    %2 = arith.cmpi ne, %1, %c0_i32_0 : i32
    scf.if %2 {
      %c0_8 = arith.constant 0 : index
      %c0_9 = arith.constant 0 : index
      %9 = vector.load %arg6[%c0_8, %c0_9] : memref<16x128xbf16, #tpu.memory_space<vmem>>, vector<16x128xbf16>
      %c0_10 = arith.constant 0 : index
      %c0_11 = arith.constant 0 : index
      %10 = vector.load %arg7[%c0_10, %c0_11] : memref<128x128xbf16, #tpu.memory_space<vmem>>, vector<128x128xbf16>
      %cst_12 = arith.constant dense<0.000000e+00> : vector<16x128xf32>
      %11 = tpu.matmul %9, %10, %cst_12 {dimension_numbers = #tpu.dot_dimension_numbers<[1], [0], [0], [1], [0, 0, 1, 1], [], []>} : vector<16x128xbf16>, vector<128x128xbf16>, vector<16x128xf32> -> vector<16x128xf32>
      %c0_13 = arith.constant 0 : index
      %c0_14 = arith.constant 0 : index
      %12 = vector.load %arg5[%c0_13, %c0_14] : memref<1x128xf32, #tpu.memory_space<vmem>>, vector<1x128xf32>
      %13 = vector.broadcast %12 : vector<1x128xf32> to vector<16x128xf32>
      %14 = arith.addf %11, %13 : vector<16x128xf32>
      %c0_15 = arith.constant 0 : index
      %c0_16 = arith.constant 0 : index
      %15 = vector.load %arg8[%c0_15, %c0_16] : memref<16x128xf32, #tpu.memory_space<vmem>>, vector<16x128xf32>
      tpu.vector_store %arg8[%c0_15, %c0_16], %14 {strides = array<i32>} : memref<16x128xf32, #tpu.memory_space<vmem>>, vector<16x128xf32>,
    } else {
    }
    %c0 = arith.constant 0 : index
    %c0_1 = arith.constant 0 : index
    %3 = vector.load %arg8[%c0, %c0_1] : memref<16x128xf32, #tpu.memory_space<vmem>>, vector<16x128xf32>
    %c0_2 = arith.constant 0 : index
    %c0_3 = arith.constant 0 : index
    %4 = vector.load %arg3[%c0_2, %c0_3] : memref<16x128xbf16, #tpu.memory_space<vmem>>, vector<16x128xbf16>
    %c0_4 = arith.constant 0 : index
    %c0_5 = arith.constant 0 : index
    %5 = vector.load %arg4[%c0_4, %c0_5] : memref<128x128xbf16, #tpu.memory_space<vmem>>, vector<128x128xbf16>
    %cst = arith.constant dense<0.000000e+00> : vector<16x128xf32>
    %6 = tpu.matmul %4, %5, %cst {dimension_numbers = #tpu.dot_dimension_numbers<[1], [0], [0], [1], [0, 0, 1, 1], [], []>} : vector<16x128xbf16>, vector<128x128xbf16>, vector<16x128xf32> -> vector<16x128xf32>
    %7 = arith.addf %3, %6 : vector<16x128xf32>
    %c0_6 = arith.constant 0 : index
    %c0_7 = arith.constant 0 : index
    %8 = vector.load %arg8[%c0_6, %c0_7] : memref<16x128xf32, #tpu.memory_space<vmem>>, vector<16x128xf32>
    tpu.vector_store %arg8[%c0_6, %c0_7], %7 {strides = array<i32>} : memref<16x128xf32, #tpu.memory_space<vmem>>, vector<16x128xf32>,
    return
  }
  func.func @transform_0(%arg0: i32, %arg1: i32, %arg2: i32) -> (i32, i32) {
    %c0_i32 = arith.constant 0 : i32
    return %arg0, %arg2 : i32, i32
  }
  func.func @transform_1(%arg0: i32, %arg1: i32, %arg2: i32) -> (i32, i32) {
    %c0_i32 = arith.constant 0 : i32
    return %arg2, %arg1 : i32, i32
  }
  func.func @transform_2(%arg0: i32, %arg1: i32, %arg2: i32) -> (i32, i32) {
    %c0_i32 = arith.constant 0 : i32
    %c0_i32_0 = arith.constant 0 : i32
    return %c0_i32, %arg1 : i32, i32
  }
  func.func @transform_3(%arg0: i32, %arg1: i32, %arg2: i32) -> (i32, i32) {
    %c0_i32 = arith.constant 0 : i32
    %c0_i32_0 = arith.constant 0 : i32
    return %arg0, %c0_i32 : i32, i32
  }
  func.func @transform_4(%arg0: i32, %arg1: i32, %arg2: i32) -> (i32, i32) {
    %c0_i32 = arith.constant 0 : i32
    %c0_i32_0 = arith.constant 0 : i32
    return %c0_i32, %arg1 : i32, i32
  }
  func.func @transform_5(%arg0: i32, %arg1: i32, %arg2: i32) -> (i32, i32) {
    %c0_i32 = arith.constant 0 : i32
    return %arg0, %arg1 : i32, i32
  }
}

</mosaic_0001>

<bundles_post_ra>
// kernel: tpu_custom_call.1
= control target key start
LH: loop header
LB: loop body
LE: loop exit
PB: predicated region body
PF: predicated region fallthrough
CT: control target
= control target key end

     0   :  { %10 = vsyncpa [#allocation3], 0  ;;  %s578_s0 = inlined_call_operand.hbm [shape: bf16[16,128], index: 0, kind: input, shape index: {}]   ;;  %s579_s1 = inlined_call_operand.hbm [shape: bf16[128,128], index: 1, kind: input, shape index: {}]   ;;  %s580_s2 = inlined_call_operand.vmem [shape: f32[1,128], index: 2, kind: input, shape index: {}]   ;;  %s581_s3 = inlined_call_operand.hbm [shape: bf16[16,128], index: 3, kind: input, shape index: {}]   ;;  %s582_s4 = inlined_call_operand.hbm [shape: bf16[128,128], index: 4, kind: input, shape index: {}]   ;;  %s583_s5 = inlined_call_operand.hbm [shape: f32[16,128], index: 5, kind: output, shape index: {}]  }
   0x1   :  { %11 = vsyncpa [#allocation6], 0 }
   0x2   :  { %12 = vsyncpa [#allocation9], 0 }
   0x3   :  { %13 = vsyncpa [#allocation4], 0  ;;  %s31_s20 = sshll.u32 %s579_s1, 4  ;;  %s521_s21 = smov [#allocation5]   ;;  %s32_s20 = int_to_ptr.hbm [resolvable:$true] %s31_s20 }
   0x4   :  { %s33_s22 = sshll.u32 %s521_s21, 4  ;;  %s18_s25 = sshll.u32 %s578_s0, 4  ;;  %s34_s22 = int_to_ptr.vmem [resolvable:$true] %s33_s22  ;;  %s19_s25 = int_to_ptr.hbm [resolvable:$true] %s18_s25 }
   0x5   :  { %s522_s26 = smov 64   ;;  %s523_s27 = smov 4  }
   0x6   :  { %39 = dma.hbm_to_vmem [thread:$0]  %s32_s20, 1024, %s34_s22, [#allocation6], %s522_s26, %s522_s26, %s523_s27  }
   0x7   :  { %s524_s28 = smov [#allocation2]   ;;  %s46_s7 = sshll.u32 %s581_s3, 4  ;;  %s47_s7 = int_to_ptr.hbm [resolvable:$true] %s46_s7 }
   0x8   :  { %s20_s29 = sshll.u32 %s524_s28, 4  ;;  %s59_s9 = sshll.u32 %s582_s4, 4  ;;  %s21_s29 = int_to_ptr.vmem [resolvable:$true] %s20_s29  ;;  %s60_s9 = int_to_ptr.hbm [resolvable:$true] %s59_s9 }
   0x9   :  { %26 = dma.hbm_to_vmem [thread:$0]  %s19_s25, 128, %s21_s29, [#allocation3], %s522_s26, %s522_s26, %s523_s27  }
   0xa   :  { %s525_s10 = smov [#allocation7]   ;;  %s526_s0 = smov [#allocation8]  }
   0xb   :  { %s48_s11 = sshll.u32 %s525_s10, 4  ;;  %s61_s12 = sshll.u32 %s526_s0, 4  ;;  %s49_s11 = int_to_ptr.vmem [resolvable:$true] %s48_s11  ;;  %s62_s12 = int_to_ptr.vmem [resolvable:$true] %s61_s12 }
   0xc   :  { %54 = dma.hbm_to_vmem [thread:$0]  %s47_s7, 128, %s49_s11, [#allocation6], %s522_s26, %s522_s26, %s523_s27  }
   0xd   :  { %67 = dma.hbm_to_vmem [thread:$0]  %s60_s9, 1024, %s62_s12, [#allocation9], %s522_s26, %s522_s26, %s523_s27  }
   0xe   :  { %513 = dma.done.wait [#allocation3], 128  }
   0xf   :  { %514 = vsyncadd [#allocation3], 4294967168 }
  0x10   :  { %515 = dma.done.wait [#allocation6], 1152  }
  0x11   :  { %516 = vsyncadd [#allocation6], 4294966144 }
  0x12   :  { %517 = dma.done.wait [#allocation9], 1024  }
  0x13   :  { %518 = vsyncadd [#allocation9], 4294966272  ;;  %v373_v0 = vld [vmem:[#allocation8 + $0x38] sm:$0xff]  ;;  %v382_v1 = vld [vmem:[#allocation5 + $0x38] sm:$0xff]  ;;  %s527_s13 = smov [#allocation10]   ;;  %s278_s17 = sshll.u32 %s583_s5, 4  ;;  %s279_s17 = int_to_ptr.hbm [resolvable:$true] %s278_s17 }
  0x14   :  { %164 = vmatpush.bf16.msra.mxu0 %v373_v0  ;;  %254 = vmatpush.bf16.msra.mxu1 %v382_v1  ;;  %v372_v2 = vld [vmem:[#allocation8 + $0x30] sm:$0xff]  ;;  %v381_v3 = vld [vmem:[#allocation5 + $0x30] sm:$0xff]  ;;  %v380_v5 = vld [vmem:[#allocation5 + $0x28] sm:$0xff]  ;;  %s276_s14 = sshll.u32 %s527_s13, 4  ;;  %s528_s18 = smov 128   ;;  %s277_s14 = int_to_ptr.vmem [resolvable:$true] %s276_s14 }
  0x15   :  { %v371_v4 = vld [vmem:[#allocation8 + $0x28] sm:$0xff]  ;;  %v370_v6 = vld [vmem:[#allocation8 + $0x20] sm:$0xff]  ;;  %v379_v7 = vld [vmem:[#allocation5 + $0x20] sm:$0xff] }
  0x16   :  { %v369_v8 = vld [vmem:[#allocation8 + $0x18] sm:$0xff]  ;;  %v378_v9 = vld [vmem:[#allocation5 + $0x18] sm:$0xff]  ;;  %v377_v11 = vld [vmem:[#allocation5 + $0x10] sm:$0xff] }
  0x17   :  { %v368_v10 = vld [vmem:[#allocation8 + $0x10] sm:$0xff]  ;;  %v367_v12 = vld [vmem:[#allocation8 + $0x8] sm:$0xff]  ;;  %v376_v13 = vld [vmem:[#allocation5 + $0x8] sm:$0xff] }
  0x18   :  { %165 = vmatpush.bf16.msra.mxu0 %v372_v2  ;;  %255 = vmatpush.bf16.msra.mxu1 %v381_v3  ;;  %v366_v14 = vld [vmem:[#allocation8] sm:$0xff]  ;;  %v375_v15 = vld [vmem:[#allocation5] sm:$0xff]  ;;  %v374_v17 = vld [vmem:[#allocation2] sm:$0xff] }
  0x19   :  { %v365_v16 = vld [vmem:[#allocation7] sm:$0xff]  ;;  %v392_v18 = vld [vmem:[%s580_s2] ss:$0 sm:$0xff]  ;;  %s529_s2 = smov 8  }
  0x1c   :  { %166 = vmatpush.bf16.msra.mxu0 %v371_v4  ;;  %256 = vmatpush.bf16.msra.mxu1 %v380_v5 }
  0x20   :  { %167 = vmatpush.bf16.msra.mxu0 %v370_v6  ;;  %257 = vmatpush.bf16.msra.mxu1 %v379_v7 }
  0x24   :  { %168 = vmatpush.bf16.msra.mxu0 %v369_v8  ;;  %258 = vmatpush.bf16.msra.mxu1 %v378_v9 }
  0x28   :  { %169 = vmatpush.bf16.msra.mxu0 %v368_v10  ;;  %259 = vmatpush.bf16.msra.mxu1 %v377_v11 }
  0x2c   :  { %170 = vmatpush.bf16.msra.mxu0 %v367_v12  ;;  %260 = vmatpush.bf16.msra.mxu1 %v376_v13 }
  0x30   :  { %171 = vmatpush.bf16.msra.mxu0 %v366_v14  ;;  %261 = vmatpush.bf16.msra.mxu1 %v375_v15 }
  0x33   :  { %172 = vmatmul.bf16.vlgmr.msra.gmra.mxu0 %v365_v16  ;;  %262 = vmatmul.bf16.vlgmr.msra.gmra.mxu1 %v374_v17 }
  0xb0   :  { %v173_v19 = vpop.f32.mrf.mxu0  ;;  %v263_v20 = vpop.f32.mrf.mxu1 }
  0xb1   :  { %v174_v21 = vadd.f32 %v392_v18, %v173_v19 }
  0xb3   :  { %v268_v22 = vadd.f32 %v263_v20, %v174_v21 }
  0xb5   :  { %270 = vst [vmem:[#allocation10] sm:$0xff] %v268_v22 }
  0xb8   :  { %v175_v23 = vpop.f32.mrf.mxu0  ;;  %v265_v25 = vpop.f32.mrf.mxu1 }
  0xb9   :  { %v176_v24 = vadd.f32 %v392_v18, %v175_v23 }
  0xbb   :  { %v269_v26 = vadd.f32 %v265_v25, %v176_v24 }
  0xbd   :  { %271 = vst [vmem:[#allocation10 + $0x8] sm:$0xff] %v269_v26 }
  0xbe   :  { %284 = dma.vmem_to_hbm [thread:$0]  %s277_s14, 256, %s279_s17, [#allocation4], %s528_s18, %s528_s18, %s529_s2  }
  0xbf   :  { %519 = dma.done.wait [#allocation4], 256  }
  0xc0   :  { %520 = vsyncadd [#allocation4], 4294967040 }
  0xc1   :  { %289 = vsyncpa [#allocation3], 1 }
  0xc2   :  { %290 = vsyncpa [#allocation6], 1 }
  0xc3   :  { %291 = vsyncpa [#allocation9], 1 }
  0xc4   :  { %292 = vsyncpa [#allocation4], 1 }

</bundles_post_ra>
